<compile_context>
chip_gen: v5e
topology: v5e:2x2
jax: 0.10.0
libtpu: 0.0.40
codegen_flags: <defaults>
</compile_context>

<pallas_src>
import functools

import jax
import jax.numpy as jnp
from jax.experimental import pallas as pl
from jax.experimental.pallas import tpu as pltpu


def _round_up(a: int, m: int) -> int:
    return (a + m - 1) // m * m


def _make_kernel(cast_x_to_bf16: bool):
    def mlp_kernel(x_ref, w1_ref, b1_ref, w2_ref, b2_ref, o_ref):
        # x_ref : (TB, D)  current batch tile (f32 in HBM/VMEM)
        # w1_ref: (H, D)   hidden_1.weight (PyTorch layout, NOT transposed)
        # b1_ref: (H, 1)   hidden_1.bias as a column
        # w2_ref: (H, 1)   output.weight as a column
        # b2_ref: (1, 1)   output.bias, SMEM scalar
        # o_ref : (1, TB)  lane-dense output tile (batch on the lane axis)
        xv = x_ref[...]
        if cast_x_to_bf16:
            # In-kernel cast: keeps HBM traffic unchanged, cuts multi-pass
            # f32 MXU work; wrapper only pre-casts the tiny W1.
            xv = xv.astype(jnp.bfloat16)

        # Layer 1 on the MXU: h[h, b] = sum_d W1[h, d] * x[b, d] -> (H, TB).
        # Same "NT" contraction as flash-attention q.k^T -- no transpose of
        # the big streamed x tile is required.
        h = jax.lax.dot_general(
            w1_ref[...], xv,
            dimension_numbers=(((1,), (1,)), ((), ())),
            preferred_element_type=jnp.float32,
        )

        # sigmoid(v) == 0.5 * tanh(0.5 * v) + 0.5 : one EUP op + cheap VALU.
        h = 0.5 * jnp.tanh(0.5 * (h + b1_ref[...])) + 0.5   # (H, TB) f32

        # Layer 2 on VPU + XLU: y[0, b] = sum_h h[h, b] * W2[0, h] -> (1, TB).
        y = jnp.sum(h * w2_ref[...], axis=0, keepdims=True)

        # Final sigmoid on the tiny (1, TB) row: exact exp + reciprocal (EUP).
        o_ref[...] = pl.reciprocal(
            1.0 + jnp.exp(-(y + b2_ref[0, 0])), approx=False
        ).astype(o_ref.dtype)

    return mlp_kernel


def classification_forward(x, w1, b1, w2, b2, *, block_b=4096,
                           use_bf16_matmul=False, vmem_limit_bytes=None):
    """x: [B, D]; w1: [H, D]; b1: [H]; w2: [1, H]; b2: [1]  (PyTorch layouts)."""
    B, D = x.shape
    H = w1.shape[0]                                 # 2 * input_dim
    LANE = 128

    # --- batch tiling -------------------------------------------------------
    b_round = _round_up(B, LANE)
    tb = max(LANE, min(_round_up(block_b, LANE), b_round))
    # Keep the grid >= 2 steps when possible so both v7x TensorCores get work.
    if b_round > LANE and pl.cdiv(b_round, tb) < 2:
        tb = _round_up(pl.cdiv(b_round, 2), LANE)
    grid = (pl.cdiv(B, tb),)   # partial last tile (if any) is masked by Pallas

    # --- tiny parameter reshapes only (no weight transposes, no x copies) ---
    b1c = b1.reshape(H, 1).astype(jnp.float32)
    w2c = w2.reshape(H, 1).astype(jnp.float32)      # W2[0, h] -> column, order kept
    b2s = b2.reshape(1, 1).astype(jnp.float32)
    w1_in = w1.astype(jnp.bfloat16) if use_bf16_matmul else w1
    # NOTE: x is intentionally NOT cast in the wrapper (that would add a full
    # HBM round trip over x); the kernel casts the streamed tile if requested.

    # --- explicit VMEM budget (raises v5e's 16 MiB default scoped limit) ----
    if vmem_limit_bytes is None:
        d_pad = _round_up(D, LANE)                  # lane padding of the D axis
        h_pad = _round_up(H, 8)
        est = (
            2 * tb * d_pad * x.dtype.itemsize              # x double-buffer
            + 2 * h_pad * d_pad * jnp.dtype(w1_in.dtype).itemsize   # W1 (x2, conservative)
            + 2 * 2 * h_pad * LANE * 4                     # b1, w2 columns
            + 2 * 8 * tb * 4                               # output double-buffer
            + 4 * h_pad * tb * 4                           # (H, tb) hidden + temporaries
        )
        # headroom, but stay below v7x's 64 MiB physical VMEM
        vmem_limit_bytes = min(max(est + (8 << 20), 16 << 20), 48 << 20)

    out_row = pl.pallas_call(
        _make_kernel(use_bf16_matmul),
        out_shape=jax.ShapeDtypeStruct((1, B), jnp.float32),
        grid=grid,
        in_specs=[
            pl.BlockSpec((tb, D), lambda i: (i, 0)),              # x: streamed tiles
            pl.BlockSpec((H, D), lambda i: (0, 0)),               # W1: VMEM-resident
            pl.BlockSpec((H, 1), lambda i: (0, 0)),               # b1: VMEM-resident
            pl.BlockSpec((H, 1), lambda i: (0, 0)),               # W2: VMEM-resident
            pl.BlockSpec(memory_space=pltpu.MemorySpace.SMEM),    # b2: SMEM scalar
        ],
        out_specs=pl.BlockSpec((1, tb), lambda i: (0, i)),
        compiler_params=pltpu.CompilerParams(
            dimension_semantics=("parallel",),
            vmem_limit_bytes=int(vmem_limit_bytes),
        ),
    )(x, w1_in, b1c, w2c, b2s)

    return out_row.reshape(B, 1)                    # (1, B) -> (B, 1), same linear order


def reference_forward(x, w1, b1, w2, b2):
    h = jax.nn.sigmoid(x @ w1.T + b1)
    return jax.nn.sigmoid(h @ w2.T + b2)


if __name__ == "__main__":
    key = jax.random.PRNGKey(0)
    batch = 256                                     # two 128-wide lane-dense tiles
    input_dim = 32                                  # stands in for train_data.shape[1]
    hidden = 2 * input_dim

    kx, k1, k2, k3, k4 = jax.random.split(key, 5)
    x = jax.random.normal(kx, (batch, input_dim), dtype=jnp.float32)
    # deterministic synthetic parameters (PyTorch nn.Linear shapes)
    w1 = 0.1 * jax.random.normal(k1, (hidden, input_dim), dtype=jnp.float32)
    b1 = 0.1 * jax.random.normal(k2, (hidden,), dtype=jnp.float32)
    w2 = 0.1 * jax.random.normal(k3, (1, hidden), dtype=jnp.float32)
    b2 = 0.1 * jax.random.normal(k4, (1,), dtype=jnp.float32)

    ref = reference_forward(x, w1, b1, w2, b2)

    # f32 path: must match the reference tightly.
    out = classification_forward(x, w1, b1, w2, b2)
    out = jax.block_until_ready(out)
    assert out.shape == (batch, 1)
    assert jnp.allclose(out, ref, atol=1e-5, rtol=1e-5), "f32 mismatch vs reference"

    # bf16-matmul path (x cast in-kernel): looser tolerance by construction.
    out_bf16 = classification_forward(x, w1, b1, w2, b2, use_bf16_matmul=True)
    out_bf16 = jax.block_until_ready(out_bf16)
    assert jnp.allclose(out_bf16, ref, atol=3e-2, rtol=3e-2), "bf16 mismatch vs reference"

    print("KERNEL_OK")
</pallas_src>

<mosaic_0001>
module attributes {stable_mosaic.version = 11 : i64} {
  func.func @mlp_kernel(%arg0: i32, %arg1: memref<128x32xf32, #tpu.memory_space<vmem>>, %arg2: memref<64x32xf32, #tpu.memory_space<vmem>>, %arg3: memref<64x1xf32, #tpu.memory_space<vmem>>, %arg4: memref<64x1xf32, #tpu.memory_space<vmem>>, %arg5: memref<1x1xf32, #tpu.memory_space<smem>>, %arg6: memref<1x128xf32, #tpu.memory_space<vmem>>) attributes {dimension_semantics = [#tpu.dimension_semantics<parallel>], iteration_bounds = array<i64: 2>, scalar_prefetch = 0 : i64, scratch_operands = 0 : i64, tpu.core_type = #tpu.core_type<tc>, window_params = [{transform_indices = @transform_0, window_bounds = array<i64: 128, 32>}, {pipeline_mode = #tpu.pipeline_mode<synchronous>, transform_indices = @transform_1, window_bounds = array<i64: 64, 32>}, {pipeline_mode = #tpu.pipeline_mode<synchronous>, transform_indices = @transform_2, window_bounds = array<i64: 64, 1>}, {pipeline_mode = #tpu.pipeline_mode<synchronous>, transform_indices = @transform_3, window_bounds = array<i64: 64, 1>}, {transform_indices = @transform_4, window_bounds = array<i64: 1, 1>}, {transform_indices = @transform_5, window_bounds = array<i64: 1, 128>}]} {
    %c0 = arith.constant 0 : index
    %c0_0 = arith.constant 0 : index
    %0 = vector.load %arg1[%c0, %c0_0] : memref<128x32xf32, #tpu.memory_space<vmem>>, vector<128x32xf32>
    %c0_1 = arith.constant 0 : index
    %c0_2 = arith.constant 0 : index
    %1 = vector.load %arg2[%c0_1, %c0_2] : memref<64x32xf32, #tpu.memory_space<vmem>>, vector<64x32xf32>
    %cst = arith.constant dense<0.000000e+00> : vector<64x128xf32>
    %2 = tpu.matmul %1, %0, %cst {dimension_numbers = #tpu.dot_dimension_numbers<[1], [1], [0], [0], [0, 0, 1, 0], [], []>} : vector<64x32xf32>, vector<128x32xf32>, vector<64x128xf32> -> vector<64x128xf32>
    %c0_3 = arith.constant 0 : index
    %c0_4 = arith.constant 0 : index
    %3 = vector.load %arg3[%c0_3, %c0_4] : memref<64x1xf32, #tpu.memory_space<vmem>>, vector<64x1xf32>
    %4 = vector.broadcast %3 : vector<64x1xf32> to vector<64x128xf32>
    %5 = arith.addf %2, %4 : vector<64x128xf32>
    %cst_5 = arith.constant 5.000000e-01 : f32
    %6 = vector.broadcast %cst_5 : f32 to vector<64x128xf32>
    %7 = arith.mulf %6, %5 : vector<64x128xf32>
    %8 = math.tanh %7 : vector<64x128xf32>
    %cst_6 = arith.constant 5.000000e-01 : f32
    %9 = vector.broadcast %cst_6 : f32 to vector<64x128xf32>
    %10 = arith.mulf %9, %8 : vector<64x128xf32>
    %cst_7 = arith.constant 5.000000e-01 : f32
    %11 = vector.broadcast %cst_7 : f32 to vector<64x128xf32>
    %12 = arith.addf %10, %11 : vector<64x128xf32>
    %c0_8 = arith.constant 0 : index
    %c0_9 = arith.constant 0 : index
    %13 = vector.load %arg4[%c0_8, %c0_9] : memref<64x1xf32, #tpu.memory_space<vmem>>, vector<64x1xf32>
    %14 = vector.broadcast %13 : vector<64x1xf32> to vector<64x128xf32>
    %15 = arith.mulf %12, %14 : vector<64x128xf32>
    %cst_10 = arith.constant dense<0.000000e+00> : vector<128xf32>
    %16 = vector.multi_reduction <add>, %15, %cst_10 [0] : vector<64x128xf32> to vector<128xf32>
    %17 = vector.shape_cast %16 : vector<128xf32> to vector<1x128xf32>
    %c0_11 = arith.constant 0 : index
    %c0_12 = arith.constant 0 : index
    %18 = memref.load %arg5[%c0_11, %c0_12] : memref<1x1xf32, #tpu.memory_space<smem>>
    %19 = vector.broadcast %18 : f32 to vector<1x128xf32>
    %20 = arith.addf %17, %19 : vector<1x128xf32>
    %cst_13 = arith.constant 0.000000e+00 : f32
    %21 = vector.broadcast %cst_13 : f32 to vector<1x128xf32>
    %22 = arith.subf %21, %20 : vector<1x128xf32>
    %23 = math.exp %22 : vector<1x128xf32>
    %cst_14 = arith.constant 1.000000e+00 : f32
    %24 = vector.broadcast %cst_14 : f32 to vector<1x128xf32>
    %25 = arith.addf %24, %23 : vector<1x128xf32>
    %26 = tpu.reciprocal %25 : vector<1x128xf32> -> vector<1x128xf32>
    %c0_15 = arith.constant 0 : index
    %c0_16 = arith.constant 0 : index
    %27 = vector.load %arg6[%c0_15, %c0_16] : memref<1x128xf32, #tpu.memory_space<vmem>>, vector<1x128xf32>
    tpu.vector_store %arg6[%c0_15, %c0_16], %26 {strides = array<i32>} : memref<1x128xf32, #tpu.memory_space<vmem>>, vector<1x128xf32>,
    return
  }
  func.func @transform_0(%arg0: i32) -> (i32, i32) {
    %c0_i32 = arith.constant 0 : i32
    %c0_i32_0 = arith.constant 0 : i32
    return %arg0, %c0_i32 : i32, i32
  }
  func.func @transform_1(%arg0: i32) -> (i32, i32) {
    %c0_i32 = arith.constant 0 : i32
    %c0_i32_0 = arith.constant 0 : i32
    %c0_i32_1 = arith.constant 0 : i32
    return %c0_i32, %c0_i32_0 : i32, i32
  }
  func.func @transform_2(%arg0: i32) -> (i32, i32) {
    %c0_i32 = arith.constant 0 : i32
    %c0_i32_0 = arith.constant 0 : i32
    %c0_i32_1 = arith.constant 0 : i32
    return %c0_i32, %c0_i32_0 : i32, i32
  }
  func.func @transform_3(%arg0: i32) -> (i32, i32) {
    %c0_i32 = arith.constant 0 : i32
    %c0_i32_0 = arith.constant 0 : i32
    %c0_i32_1 = arith.constant 0 : i32
    return %c0_i32, %c0_i32_0 : i32, i32
  }
  func.func @transform_4(%arg0: i32) -> (i32, i32) {
    %c0_i32 = arith.constant 0 : i32
    %c0_i32_0 = arith.constant 0 : i32
    %c0_i32_1 = arith.constant 0 : i32
    return %c0_i32, %c0_i32_0 : i32, i32
  }
  func.func @transform_5(%arg0: i32) -> (i32, i32) {
    %c0_i32 = arith.constant 0 : i32
    %c0_i32_0 = arith.constant 0 : i32
    return %c0_i32, %arg0 : i32, i32
  }
}

</mosaic_0001>

<bundles_post_ra>
// kernel: tpu_custom_call.1
= control target key start
LH: loop header
LB: loop body
LE: loop exit
PB: predicated region body
PF: predicated region fallthrough
CT: control target
= control target key end

     0   :  { %s1089_s0 = inlined_call_operand.vmem [shape: f32[256,32], index: 0, kind: input, shape index: {}]   ;;  %s1090_s1 = inlined_call_operand.vmem [shape: f32[64,32], index: 1, kind: input, shape index: {}]   ;;  %s1091_s2 = inlined_call_operand.vmem [shape: f32[64,1], index: 2, kind: input, shape index: {}]   ;;  %s1092_s3 = inlined_call_operand.vmem [shape: f32[64,1], index: 3, kind: input, shape index: {}]   ;;  %s1093_s4 = inlined_call_operand.<no memory space> [shape: f32[1,1], index: 4, kind: input, shape index: {}]   ;;  %s1094_s5 = inlined_call_operand.hbm [shape: f32[1,256], index: 5, kind: output, shape index: {}]  }
   0x1   :  { %10 = sst [smem:[#allocation2]] %s1093_s4 }
   0x2   :  { %11 = vsyncpa [#allocation4], 0 }
   0x3   :  { %13 = vsyncpa [#allocation4 + $0x1], 0  ;;  %s843_s20 = smov 0   ;;  %s845_s21 = smov 0  }
   0x4   :  { %s847_s22 = smov 0   ;;  %s849_s23 = smov 0  }
   0x5 LB: > { %s864_s4 = sadd.s32 4294967295, %s807_s23   ;;  %s602_s24 = sadd.s32 4294967294, %s807_s23   ;;  %s807_s23 = sphi %s849_s23, %s1100_s23   ;;  %s803_s22 = sphi %s847_s22, %s1099_s22   ;;  %s799_s21 = sphi %s845_s21, %s1098_s21   ;;  %s795_s20 = sphi %s843_s20, %s1097_s20  }
   0x6   : > { %s868_s25 = sadd.s32 1, %s807_s23   ;;  %s136_s26 = sadd.s32 1, %s803_s22 }
   0x7   : > { %s133_s27 = ssub.s32 %s807_s23, %s868_s25  ;;  %p146_p0 = scmp.ne.s32.totalorder %s803_s22, %s799_s21 }
   0x8   : > { %p134_p1 = scmp.eq.s32.totalorder %s133_s27, 0  ;;  %p147_p2 = scmp.eq.s32.totalorder %s864_s4, 1 }
   0x9   : > { %p152_p3 = scmp.ne.s32.totalorder %s799_s21, %s795_s20  ;;  %p153_p4 = scmp.eq.s32.totalorder %s602_s24, 1 }
   0xa   : > { %s879_s28 = scalar_select %p134_p1, %s803_s22, %s136_s26  }
   0xb   : > { %p881_p5 = por %p147_p2, %p146_p0  ;;  %p885_p6 = por %p153_p4, %p152_p3 }
   0xc   : > { %p605_p7 = scmp.ge.s32.totalorder %s807_s23, 1  ;;  %p192_p8 = scmp.lt.s32.totalorder %s807_s23, 3 }
   0xe   : > { %p193_p9 = pnand %p605_p7, %p192_p8 }
   0xf   : > { %s606_s6 = sshll.u32 (!%p193_p9), %s864_s4, 4  ;;  %s512_s9 = sld [smem:[#allocation2]] (!%p193_p9) }
  0x10   : > { %196 = sbr.rel (%p193_p9) target bundleno = 300 (0x12c), region = 40  ;;  %p220_p10 = scmp.lt.s32.totalorder (!%p193_p9), %s606_s6, 31 }
  0x11   : > { %s217_s10 = sand.u32 (!%p193_p9), 1, %s799_s21   ;;  %s543_s14 = scalar_lea.hbm (!%p193_p9), %s1094_s5, %s864_s4 }
  0x12   : > { %s547_s16 = sshll.u32 (!%p193_p9), %s543_s14, 4  ;;  %s535_s17 = scalar_lea.sflag (!%p193_p9), [#allocation4], %s217_s10  ;;  %s548_s16 = int_to_ptr.hbm [resolvable:$true] %s547_s16 }
  0x13   : > { %s759_s4 = sshra.s32 (!%p193_p9), %s548_s16, 4  ;;  %s765_s26 = scalar_lea.hbm (!%p193_p9), %s1094_s5, 2  ;;  %s760_s4 = int_to_ptr.hbm [resolvable:$true] %s759_s4 }
  0x14   : > { %s761_s18 = scalar_lea.hbm (!%p193_p9), %s760_s4, 1  ;;  %p766_p0 = scmp.lt.s32.totalorder (!%p193_p9), %s760_s4, %s1094_s5 }
  0x15   : > { %v809_v0 = vmov 0   ;;  %s1102_s6 = smov (!%p220_p10, %s606_s6), 31  ;;  %vm297_vm0 = vcmask 261120   ;;  %v249_v1 = vld [vmem:[%s1091_s2] sm:$0xff]  ;;  %v250_v5 = vld [vmem:[%s1091_s2 + $0x8] sm:$0xff]  ;;  %v251_v7 = vld [vmem:[%s1091_s2 + $0x10] sm:$0xff]  ;;  %p762_p11 = scmp.ne.s32.totalorder %s760_s4, %s761_s18 }
  0x16   : > { %722 = vset.pattern.permute.xlu0 %v809_v0  ;;  %723 = vset.pattern.permute.xlu1 %v809_v0  ;;  %s607_s7 = sshll.u32 %s1102_s6, 3  ;;  %v255_v9 = vld [vmem:[%s1091_s2 + $0x30] sm:$0xff]  ;;  %v252_v11 = vld [vmem:[%s1091_s2 + $0x18] sm:$0xff]  ;;  %v444_v13 = vld [vmem:[%s1092_s3 + $0x8] sm:$0xff]  ;;  %p767_p1 = scmp.lt.s32.totalorder %s765_s26, %s761_s18 }
  0x17   : > { %724 = vset.pattern.permute.xlu2 %v809_v0  ;;  %s898_s12 = scalar_lea.vmem %s1089_s0, %s607_s7  ;;  %259 = vperm.xlu0 %722, %v249_v1   ;;  %v256_v15 = vld [vmem:[%s1091_s2 + $0x38] sm:$0xff]  ;;  %v447_v17 = vld [vmem:[%s1092_s3 + $0x20] sm:$0xff]  ;;  %v445_v18 = vld [vmem:[%s1092_s3 + $0x10] sm:$0xff]  ;;  %p763_p12 = pnand %p762_p11, %p881_p5 }
  0x18   : > { %v240_v2 = vld [vmem:[%s898_s12 + $0x78] sm:$0xff]  ;;  %v239_v3 = vld [vmem:[%s898_s12 + $0x70] sm:$0xff]  ;;  %v238_v4 = vld [vmem:[%s898_s12 + $0x68] sm:$0xff]  ;;  %269 = vperm.xlu1 %723, %v251_v7   ;;  %p768_p2 = por %p767_p1, %p766_p0 }
  0x19   : > { %608 = vmatpush.xpose.msk.msra.mxu0 %vm297_vm0, %v240_v2  ;;  %634 = vmatpush.xpose.msk.msra.mxu1 %vm297_vm0, %v240_v2  ;;  %v237_v6 = vld [vmem:[%s898_s12 + $0x60] sm:$0xff]  ;;  %v236_v8 = vld [vmem:[%s898_s12 + $0x58] sm:$0xff]  ;;  %v235_v10 = vld [vmem:[%s898_s12 + $0x50] sm:$0xff]  ;;  %p764_p13 = pneg %p763_p12 }
  0x1a   : > { %635 = vmatpush.xpose.msk.msra.mxu2 %vm297_vm0, %v240_v2  ;;  %636 = vmatpush.xpose.msk.msra.mxu3 %vm297_vm0, %v240_v2  ;;  %v234_v12 = vld [vmem:[%s898_s12 + $0x48] sm:$0xff]  ;;  %v233_v14 = vld [vmem:[%s898_s12 + $0x40] sm:$0xff]  ;;  %v232_v16 = vld [vmem:[%s898_s12 + $0x38] sm:$0xff] }
  0x1b   : > { %v253_v19 = vld [vmem:[%s1091_s2 + $0x20] sm:$0xff]  ;;  %v231_v20 = vld [vmem:[%s898_s12 + $0x30] sm:$0xff]  ;;  %v450_v21 = vld [vmem:[%s1092_s3 + $0x38] sm:$0xff]  ;;  %p769_p3 = pnand %p768_p2, %p764_p13 }
  0x1c   : > { %279 = vperm.xlu2 %724, %v253_v19   ;;  %v230_v22 = vld [vmem:[%s898_s12 + $0x28] sm:$0xff]  ;;  %v229_v25 = vld [vmem:[%s898_s12 + $0x20] sm:$0xff]  ;;  %v228_v26 = vld [vmem:[%s898_s12 + $0x18] sm:$0xff] }
  0x1d   : > { %609 = vmatpush.xpose.msk.msra.mxu0 %vm297_vm0, %v239_v3  ;;  %637 = vmatpush.xpose.msk.msra.mxu1 %vm297_vm0, %v239_v3  ;;  %v448_v23 = vld [vmem:[%s1092_s3 + $0x28] sm:$0xff]  ;;  %v443_v27 = vld [vmem:[%s1092_s3] sm:$0xff]  ;;  %v227_v28 = vld [vmem:[%s898_s12 + $0x10] sm:$0xff] }
  0x1e   : > { %638 = vmatpush.xpose.msk.msra.mxu2 %vm297_vm0, %v239_v3  ;;  %639 = vmatpush.xpose.msk.msra.mxu3 %vm297_vm0, %v239_v3  ;;  %v254_v24 = vld [vmem:[%s1091_s2 + $0x28] sm:$0xff]  ;;  %v446_v30 = vld [vmem:[%s1092_s3 + $0x18] sm:$0xff]  ;;  %v225_v31 = vld [vmem:[%s898_s12] sm:$0xff] }
  0x1f   : > { %264 = vperm.xlu0 %722, %v250_v5   ;;  %v226_v29 = vld [vmem:[%s898_s12 + $0x8] sm:$0xff]  ;;  %v241_v32 = vld [vmem:[%s1090_s1] sm:$0xff]  ;;  %v243_v33 = vld [vmem:[%s1090_s1 + $0x10] sm:$0xff]  ;;  %s218_s12 = scalar_lea.vmem [#allocation3], %s217_s10 }
  0x20   : > { %274 = vperm.xlu1 %723, %v252_v11   ;;  %v245_v34 = vld [vmem:[%s1090_s1 + $0x20] sm:$0xff]  ;;  %v247_v35 = vld [vmem:[%s1090_s1 + $0x30] sm:$0xff]  ;;  %v242_v37 = vld [vmem:[%s1090_s1 + $0x8] sm:$0xff]  ;;  %s545_s15 = sshll.u32 %s218_s12, 4  ;;  %s546_s15 = int_to_ptr.vmem [resolvable:$true] %s545_s15 }
  0x21   : > { %610 = vmatpush.xpose.msk.msra.mxu0 %vm297_vm0, %v238_v4  ;;  %640 = vmatpush.xpose.msk.msra.mxu1 %vm297_vm0, %v238_v4  ;;  %v449_v36 = vld [vmem:[%s1092_s3 + $0x30] sm:$0xff]  ;;  %v244_v38 = vld [vmem:[%s1090_s1 + $0x18] sm:$0xff]  ;;  %v246_v39 = vld [vmem:[%s1090_s1 + $0x28] sm:$0xff] }
  0x22   : > { %641 = vmatpush.xpose.msk.msra.mxu2 %vm297_vm0, %v238_v4  ;;  %642 = vmatpush.xpose.msk.msra.mxu3 %vm297_vm0, %v238_v4  ;;  %v248_v40 = vld [vmem:[%s1090_s1 + $0x38] sm:$0xff] }
  0x24   : > { %284 = vperm.xlu2 %724, %v254_v24  }
  0x25   : > { %611 = vmatpush.xpose.msk.msra.mxu0 %vm297_vm0, %v237_v6  ;;  %643 = vmatpush.xpose.msk.msra.mxu1 %vm297_vm0, %v237_v6 }
  0x26   : > { %644 = vmatpush.xpose.msk.msra.mxu2 %vm297_vm0, %v237_v6  ;;  %645 = vmatpush.xpose.msk.msra.mxu3 %vm297_vm0, %v237_v6 }
  0x27   : > { %289 = vperm.xlu0 %722, %v255_v9  }
  0x28   : > { %294 = vperm.xlu1 %723, %v256_v15  }
  0x29   : > { %612 = vmatpush.xpose.msk.msra.mxu0 %vm297_vm0, %v236_v8  ;;  %646 = vmatpush.xpose.msk.msra.mxu1 %vm297_vm0, %v236_v8 }
  0x2a   : > { %647 = vmatpush.xpose.msk.msra.mxu2 %vm297_vm0, %v236_v8  ;;  %648 = vmatpush.xpose.msk.msra.mxu3 %vm297_vm0, %v236_v8 }
  0x2c   : > { %453 = vperm.xlu2 %724, %v443_v27  }
  0x2d   : > { %613 = vmatpush.xpose.msk.msra.mxu0 %vm297_vm0, %v235_v10  ;;  %649 = vmatpush.xpose.msk.msra.mxu1 %vm297_vm0, %v235_v10 }
  0x2e   : > { %650 = vmatpush.xpose.msk.msra.mxu2 %vm297_vm0, %v235_v10  ;;  %651 = vmatpush.xpose.msk.msra.mxu3 %vm297_vm0, %v235_v10 }
  0x2f   : > { %458 = vperm.xlu0 %722, %v444_v13  }
  0x30   : > { %463 = vperm.xlu1 %723, %v445_v18  }
  0x31   : > { %614 = vmatpush.xpose.msk.msra.mxu0 %vm297_vm0, %v234_v12  ;;  %652 = vmatpush.xpose.msk.msra.mxu1 %vm297_vm0, %v234_v12 }
  0x32   : > { %653 = vmatpush.xpose.msk.msra.mxu2 %vm297_vm0, %v234_v12  ;;  %654 = vmatpush.xpose.msk.msra.mxu3 %vm297_vm0, %v234_v12 }
  0x34   : > { %468 = vperm.xlu2 %724, %v446_v30  }
  0x35   : > { %615 = vmatpush.xpose.msk.msra.mxu0 %vm297_vm0, %v233_v14  ;;  %655 = vmatpush.xpose.msk.msra.mxu1 %vm297_vm0, %v233_v14 }
  0x36   : > { %656 = vmatpush.xpose.msk.msra.mxu2 %vm297_vm0, %v233_v14  ;;  %657 = vmatpush.xpose.msk.msra.mxu3 %vm297_vm0, %v233_v14 }
  0x37   : > { %473 = vperm.xlu0 %722, %v447_v17  }
  0x38   : > { %478 = vperm.xlu1 %723, %v448_v23  }
  0x39   : > { %616 = vmatpush.xpose.msk.msra.mxu0 %vm297_vm0, %v232_v16  ;;  %658 = vmatpush.xpose.msk.msra.mxu1 %vm297_vm0, %v232_v16 }
  0x3a   : > { %659 = vmatpush.xpose.msk.msra.mxu2 %vm297_vm0, %v232_v16  ;;  %660 = vmatpush.xpose.msk.msra.mxu3 %vm297_vm0, %v232_v16 }
  0x3c   : > { %483 = vperm.xlu2 %724, %v449_v36  }
  0x3d   : > { %617 = vmatpush.xpose.msk.msra.mxu0 %vm297_vm0, %v231_v20  ;;  %661 = vmatpush.xpose.msk.msra.mxu1 %vm297_vm0, %v231_v20 }
  0x3e   : > { %662 = vmatpush.xpose.msk.msra.mxu2 %vm297_vm0, %v231_v20  ;;  %663 = vmatpush.xpose.msk.msra.mxu3 %vm297_vm0, %v231_v20 }
  0x3f   : > { %488 = vperm.xlu0 %722, %v450_v21  }
  0x41   : > { %618 = vmatpush.xpose.msk.msra.mxu0 %vm297_vm0, %v230_v22  ;;  %664 = vmatpush.xpose.msk.msra.mxu1 %vm297_vm0, %v230_v22 }
  0x42   : > { %665 = vmatpush.xpose.msk.msra.mxu2 %vm297_vm0, %v230_v22  ;;  %666 = vmatpush.xpose.msk.msra.mxu3 %vm297_vm0, %v230_v22 }
  0x45   : > { %619 = vmatpush.xpose.msk.msra.mxu0 %vm297_vm0, %v229_v25  ;;  %667 = vmatpush.xpose.msk.msra.mxu1 %vm297_vm0, %v229_v25 }
  0x46   : > { %668 = vmatpush.xpose.msk.msra.mxu2 %vm297_vm0, %v229_v25  ;;  %669 = vmatpush.xpose.msk.msra.mxu3 %vm297_vm0, %v229_v25 }
  0x49   : > { %620 = vmatpush.xpose.msk.msra.mxu0 %vm297_vm0, %v228_v26  ;;  %670 = vmatpush.xpose.msk.msra.mxu1 %vm297_vm0, %v228_v26 }
  0x4a   : > { %671 = vmatpush.xpose.msk.msra.mxu2 %vm297_vm0, %v228_v26  ;;  %672 = vmatpush.xpose.msk.msra.mxu3 %vm297_vm0, %v228_v26 }
  0x4d   : > { %621 = vmatpush.xpose.msk.msra.mxu0 %vm297_vm0, %v227_v28  ;;  %673 = vmatpush.xpose.msk.msra.mxu1 %vm297_vm0, %v227_v28 }
  0x4e   : > { %674 = vmatpush.xpose.msk.msra.mxu2 %vm297_vm0, %v227_v28  ;;  %675 = vmatpush.xpose.msk.msra.mxu3 %vm297_vm0, %v227_v28 }
  0x51   : > { %622 = vmatpush.xpose.msk.msra.mxu0 %vm297_vm0, %v226_v29  ;;  %676 = vmatpush.xpose.msk.msra.mxu1 %vm297_vm0, %v226_v29 }
  0x52   : > { %677 = vmatpush.xpose.msk.msra.mxu2 %vm297_vm0, %v226_v29  ;;  %678 = vmatpush.xpose.msk.msra.mxu3 %vm297_vm0, %v226_v29 }
  0x55   : > { %623 = vmatpush.xpose.msk.msra.mxu0 %vm297_vm0, %v225_v31  ;;  %679 = vmatpush.xpose.msk.msra.mxu1 %vm297_vm0, %v225_v31 }
  0x56   : > { %680 = vmatpush.xpose.msk.msra.mxu2 %vm297_vm0, %v225_v31  ;;  %681 = vmatpush.xpose.msk.msra.mxu3 %vm297_vm0, %v225_v31 }
  0x58   : > { %624 = vmatmul.msk.f32.vlgmr.msra.gmra.mxu0 %vm297_vm0, %v241_v32  ;;  %626 = vmatmul.msk.f32.vlgmr.msra.gmra.mxu1 %vm297_vm0, %v243_v33 }
  0x59   : > { %628 = vmatmul.msk.f32.vlgmr.msra.gmra.mxu2 %vm297_vm0, %v245_v34  ;;  %630 = vmatmul.msk.f32.vlgmr.msra.gmra.mxu3 %vm297_vm0, %v247_v35 }
  0x60   : > { %625 = vmatmul.msk.f32.gmra.mxu0 %vm297_vm0, %v242_v37  ;;  %627 = vmatmul.msk.f32.gmra.mxu1 %vm297_vm0, %v244_v38 }
  0x61   : > { %629 = vmatmul.msk.f32.gmra.mxu2 %vm297_vm0, %v246_v39  ;;  %631 = vmatmul.msk.f32.gmra.mxu3 %vm297_vm0, %v248_v40 }
  0x76   : > { %v280_v43 = vpop.permute.xlu2 %279 }
  0x7e   : > { %v285_v50 = vpop.permute.xlu2 %284 }
  0x86   : > { %v454_v3 = vpop.permute.xlu2 %453 }
  0x89   : > { %v260_v41 = vpop.permute.xlu0 %259 }
  0x8a   : > { %v270_v42 = vpop.permute.xlu1 %269 }
  0x8e   : > { %v469_v26 = vpop.permute.xlu2 %468 }
  0x91   : > { %v265_v44 = vpop.permute.xlu0 %264 }
  0x92   : > { %v275_v49 = vpop.permute.xlu1 %274 }
  0x99   : > { %v290_v53 = vpop.permute.xlu0 %289 }
  0x9a   : > { %v295_v1 = vpop.permute.xlu1 %294 }
  0xa1   : > { %v459_v8 = vpop.permute.xlu0 %458 }
  0xa2   : > { %v464_v20 = vpop.permute.xlu1 %463 }
  0xa9   : > { %v474_v31 = vpop.permute.xlu0 %473 }
  0xd5   : > { %v387_v45 = vpop.f32.mrf.mxu0  ;;  %v393_v46 = vpop.f32.mrf.mxu1 }
  0xd6   : > { %v388_v47 = vadd.f32 %v387_v45, %v260_v41  ;;  %v394_v48 = vadd.f32 %v393_v46, %v270_v42  ;;  %v479_v45 = vpop.permute.xlu1 %478 }
  0xd8   : > { %v411_v51 = vmul.f32 0.5, %v388_v47  ;;  %v413_v52 = vmul.f32 0.5, %v394_v48 }
  0xda   : > { %725 = vtanh.f32 %v411_v51 }
  0xdb   : > { %727 = vtanh.f32 %v413_v52  ;;  %v489_v52 = vpop.permute.xlu0 %488 }
  0xdc   : > { %v399_v54 = vpop.f32.mrf.mxu2  ;;  %v405_v55 = vpop.f32.mrf.mxu3 }
  0xdd   : > { %v400_v56 = vadd.f32 %v399_v54, %v280_v43  ;;  %v390_v57 = vpop.f32.mrf.mxu0  ;;  %v396_v58 = vpop.f32.mrf.mxu1  ;;  %v406_v62 = vadd.f32 %v405_v55, %v290_v53 }
  0xde   : > { %v391_v59 = vadd.f32 %v390_v57, %v265_v44  ;;  %v397_v60 = vadd.f32 %v396_v58, %v275_v49  ;;  %v484_v49 = vpop.permute.xlu2 %483 }
  0xdf   : > { %v415_v61 = vmul.f32 0.5, %v400_v56  ;;  %v417_v4 = vmul.f32 0.5, %v406_v62 }
  0xe0   : > { %v412_v63 = vmul.f32 0.5, %v391_v59  ;;  %v414_v0 = vmul.f32 0.5, %v397_v60  ;;  %v726_v2 = vpop.eup %725 }
  0xe1   : > { %729 = vtanh.f32 %v415_v61  ;;  %v728_v5 = vpop.eup %727  ;;  %v427_v11 = vmul.f32 0.5, %v726_v2  ;;  %v513_v61 = vstv %s512_s9 }
  0xe2   : > { %731 = vtanh.f32 %v412_v63  ;;  %v429_v12 = vmul.f32 0.5, %v728_v5 }
  0xe3   : > { %733 = vtanh.f32 %v414_v0  ;;  %v435_v18 = vadd.f32 0.5, %v427_v11 }
  0xe4   : > { %v402_v6 = vpop.f32.mrf.mxu2  ;;  %v408_v7 = vpop.f32.mrf.mxu3  ;;  %735 = vtanh.f32 %v417_v4  ;;  %v437_v21 = vadd.f32 0.5, %v429_v12 }
  0xe5   : > { %v403_v9 = vadd.f32 %v402_v6, %v285_v50  ;;  %v409_v10 = vadd.f32 %v408_v7, %v295_v1  ;;  %v491_v27 = vmul.f32 %v454_v3, %v435_v18 }
  0xe6   : > { %v493_v32 = vmul.f32 %v464_v20, %v437_v21 }
  0xe7   : > { %v416_v13 = vmul.f32 0.5, %v403_v9  ;;  %v418_v14 = vmul.f32 0.5, %v409_v10  ;;  %v730_v15 = vpop.eup %729 }
  0xe8   : > { %v732_v16 = vpop.eup %731  ;;  %v431_v23 = vmul.f32 0.5, %v730_v15 }
  0xe9   : > { %737 = vtanh.f32 %v416_v13  ;;  %v734_v17 = vpop.eup %733  ;;  %v428_v19 = vmul.f32 0.5, %v732_v16 }
  0xea   : > { %739 = vtanh.f32 %v418_v14  ;;  %v430_v22 = vmul.f32 0.5, %v734_v17  ;;  %v736_v25 = vpop.eup %735  ;;  %v439_v34 = vadd.f32 0.5, %v431_v23 }
  0xeb   : > { %v436_v24 = vadd.f32 0.5, %v428_v19  ;;  %v433_v35 = vmul.f32 0.5, %v736_v25 }
  0xec   : > { %v438_v29 = vadd.f32 0.5, %v430_v22  ;;  %v495_v42 = vmul.f32 %v474_v31, %v439_v34 }
  0xed   : > { %v492_v28 = vmul.f32 %v459_v8, %v436_v24  ;;  %v441_v43 = vadd.f32 0.5, %v433_v35 }
  0xee   : > { %v494_v38 = vmul.f32 %v469_v26, %v438_v29 }
  0xef   : > { %v738_v30 = vpop.eup %737  ;;  %v499_v36 = vadd.f32 %v492_v28, %v491_v27  ;;  %v497_v50 = vmul.f32 %v484_v49, %v441_v43 }
  0xf0   : > { %v740_v33 = vpop.eup %739  ;;  %v432_v37 = vmul.f32 0.5, %v738_v30 }
  0xf1   : > { %v500_v39 = vadd.f32 %v499_v36, %v493_v32  ;;  %v434_v41 = vmul.f32 0.5, %v740_v33 }
  0xf2   : > { %v440_v40 = vadd.f32 0.5, %v432_v37 }
  0xf3   : > { %v501_v44 = vadd.f32 %v500_v39, %v494_v38  ;;  %v442_v48 = vadd.f32 0.5, %v434_v41 }
  0xf4   : > { %v496_v46 = vmul.f32 %v479_v45, %v440_v40 }
  0xf5   : > { %v502_v47 = vadd.f32 %v501_v44, %v495_v42  ;;  %v498_v53 = vmul.f32 %v489_v52, %v442_v48 }
  0xf7   : > { %v503_v51 = vadd.f32 %v502_v47, %v496_v46 }
  0xf9   : > { %v504_v54 = vadd.f32 %v503_v51, %v497_v50 }
  0xfb   : > { %v505_v55 = vadd.f32 %v504_v54, %v498_v53 }
  0xfd   : > { %v506_v56 = vrot.slane %v505_v55, 4 }
  0xff   : > { %v507_v57 = vadd.f32 %v506_v56, %v505_v55 }
 0x101   : > { %v508_v58 = vrot.slane %v507_v57, 2 }
 0x103   : > { %v509_v59 = vadd.f32 %v508_v58, %v507_v57 }
 0x105   : > { %v510_v60 = vrot.slane %v509_v59, 1 }
 0x107   : > { %v511_v62 = vadd.f32 %v510_v60, %v509_v59 }
 0x109   : > { %v514_v63 = vadd.f32 %v513_v61, %v511_v62 }
 0x10b   : > { %v515_v0 = vsub.f32 0.0, %v514_v63 }
 0x10d   : > { %v516_v1 = vmul.f32 1.442695, %v515_v0 }
 0x10f   : > { %741 = vpow2.f32 %v516_v1 }
 0x115   : > { %v742_v2 = vpop.eup %741 }
 0x116   : > { %v518_v3 = vadd.f32 1.0, %v742_v2 }
 0x118   : > { %743 = vrcp.f32 %v518_v3  ;;  %v530_v7 = vand.u32 2147483648, %v518_v3  ;;  %v528_v9 = vand.u32 2147483647, %v518_v3  ;;  %vm524_vm2 = vweird.f32 %v518_v3 }
 0x11a   : > { %v531_v11 = vor.u32 1.1754944e-38, %v530_v7  ;;  %vm529_vm4 = vcmp.eq.f32.partialorder %v528_v9, 8.507059e+37 }
 0x11e   : > { %v744_v4 = vpop.eup %743 }
 0x11f   : > { %v520_v5 = vmul.f32 %v744_v4, %v518_v3  ;;  %vm525_vm1 = vweird.f32 %v744_v4 }
 0x120   : > { %vm526_vm3 = vmor %vm524_vm2, %vm525_vm1 }
 0x121   : > { %v521_v6 = vsub.f32 1.0, %v520_v5 }
 0x123   : > { %v522_v8 = vmul.f32 %v744_v4, %v521_v6 }
 0x125   : > { %v523_v10 = vadd.f32 %v744_v4, %v522_v8 }
 0x127   : > { %v527_v12 = vsel %vm526_vm3, %v744_v4, %v523_v10 }
 0x128   : > { %v532_v13 = vsel %vm529_vm4, %v531_v11, %v527_v12 }
 0x129   : > { %533 = vst [vmem:[%s218_s12] sm:$0x1] %v532_v13 }
 0x12a   : > { %772 = shalt.err (!%p769_p3)
}
 0x12b   : > { %682 = dma.vmem_to_hbm [thread:$0]  (%p881_p5), %s546_s15, 16, %s548_s16, %s535_s17  }
 0x12c PF: > { %p688_p4 = scmp.ge.s32.totalorder %s807_s23, 2  ;;  %s559_s7 = sand.u32 1, %s795_s20  }
 0x12d   : > { %s560_s8 = scalar_lea.sflag [#allocation4], %s559_s7 }
 0x12e   : > { %p685_p7 = pnand %p688_p4, %p885_p6 }
 0x130   : > { %p686_p8 = pneg %p685_p7 }
 0x132   : > { %790 = dma.done.wait (%p686_p8), %s560_s8, 16  }
 0x133   : > { %792 = vsyncadd (%p686_p8), %s560_s8, 4294967280  ;;  %p16_p9 = scmp.ge.s32.totalorder %s868_s25, 4   ;;  %s1097_s20 = smov %s799_s21 }
 0x134   : > { %s1098_s21 = smov %s803_s22  ;;  %s1099_s22 = smov %s879_s28 }
 0x135   : > { %s1100_s23 = smov %s868_s25  ;;  %18 = sbr.rel (!%p16_p9) target bundleno = 5 (0x5), region = 75 }
 0x13a   :  { %565 = vsyncpa [#allocation4], 1 }
 0x13b   :  { %567 = vsyncpa [#allocation4 + $0x1], 1 }

</bundles_post_ra>
